<compile_context>
chip_gen: v7x
topology: tpu7x:2x2x1
jax: 0.10.0
libtpu: 0.0.40
codegen_flags: <defaults>
</compile_context>

<pallas_src>
import jax
import jax.numpy as jnp
from jax import lax
from jax.experimental import pallas as pl
from jax.experimental.pallas import tpu as pltpu


def _vit_embed_kernel(p_ref, w_ref, add_ref, o_ref):
    # p_ref:   (Bt, N+1, K) bf16 — row 0 of every batch is zeros (cls placeholder)
    # w_ref:   (K, D)       bf16 — flattened conv weight (resident)
    # add_ref: (N+1, D)     f32  — precombined addend: row 0 = cls+pos[0],
    #                              rows 1..N = conv_bias + pos[1:]
    # o_ref:   (Bt, N+1, D)
    w = w_ref[...]
    add = add_ref[...]
    bt = p_ref.shape[0]
    # Static unroll over the (small) batch block: one MXU matmul per batch,
    # same resident RHS, fully aligned full-block stores.
    for b in range(bt):
        proj = jnp.dot(p_ref[b], w, preferred_element_type=jnp.float32)  # (N+1, D)
        # dropout_rate = 0.0 -> identity.
        # TODO(synk): stochastic dropout (rate > 0) would use pltpu.prng_seed /
        # pltpu.prng_random_bits.
        o_ref[b] = (proj + add).astype(o_ref.dtype)


def _pick_block_b(B, target=8):
    """Largest divisor of B that is <= target, preferring >= 2 grid steps."""
    divisors = [d for d in range(1, B + 1) if B % d == 0 and d <= target]
    multi_step = [d for d in divisors if B // d >= 2]
    pool = multi_step if multi_step else divisors
    return max(pool)


def _vit_embedding(x, conv_w, conv_b, cls_token, pos_embedding, *, patch_size):
    """x: (B, C, H, W) f32. Returns (B, N+1, D) = ViT Embedding forward."""
    B, C, H, W = x.shape
    ph, pw = patch_size
    D = conv_w.shape[0]
    Hp, Wp = H // ph, W // pw
    N = Hp * Wp
    K = C * ph * pw

    pos = pos_embedding.reshape(-1, pos_embedding.shape[-1])
    if pos.shape[-1] != D or pos.shape[0] < N + 1:
        raise ValueError(
            f"pos_embedding must provide at least {N + 1} rows of width {D}, "
            f"got {pos_embedding.shape}")
    pos = pos[: N + 1]                                              # (N+1, D)

    # --- wrapper-side layout glue (all compute stays in the kernel) ---------
    # im2col in bf16: non-overlapping patches flattened in (C, ph, pw) order to
    # match the PyTorch Conv2d weight layout (D, C, ph, pw).
    patches = (x.reshape(B, C, Hp, ph, Wp, pw)
                 .transpose(0, 2, 4, 1, 3, 5)
                 .reshape(B, N, K)
                 .astype(jnp.bfloat16))                             # (B, N, K)
    # Prepend one zero row per batch (cls placeholder) via a single fused pad —
    # one aligned (N+1, K) @ (K, D) matmul then covers every output row.
    patches = lax.pad(patches, jnp.zeros((), patches.dtype),
                      ((0, 0, 0), (1, 0, 0), (0, 0, 0)))            # (B, N+1, K)

    w = conv_w.reshape(D, K).T.astype(jnp.bfloat16)                 # (K, D) resident

    # Batch-invariant addend, computed once outside the grid (true hoist):
    # row 0 = cls_token + pos[0]; rows 1..N = conv_bias + pos[1:].
    addend = jnp.concatenate(
        [cls_token.reshape(1, D) + pos[0:1],
         conv_b.reshape(1, D) + pos[1:]], axis=0).astype(jnp.float32)  # (N+1, D)

    Bt = _pick_block_b(B)
    grid = (B // Bt,)

    out = pl.pallas_call(
        _vit_embed_kernel,
        out_shape=jax.ShapeDtypeStruct((B, N + 1, D), x.dtype),
        grid_spec=pltpu.PrefetchScalarGridSpec(
            num_scalar_prefetch=0,
            grid=grid,
            in_specs=[
                pl.BlockSpec((Bt, N + 1, K), lambda i: (i, 0, 0)),  # patches tile
                pl.BlockSpec((K, D), lambda i: (0, 0)),             # W  (resident)
                pl.BlockSpec((N + 1, D), lambda i: (0, 0)),         # addend (resident)
            ],
            out_specs=pl.BlockSpec((Bt, N + 1, D), lambda i: (i, 0, 0)),
        ),
        compiler_params=pltpu.CompilerParams(
            dimension_semantics=("parallel",)),
    )(patches, w, addend)
    return out


vit_embedding = jax.jit(_vit_embedding, static_argnames=("patch_size",))


if __name__ == "__main__":
    # Small ViT-ish shapes, lane-dense feature dim: C=3, 32x32 image, 8x8
    # patches -> N=16 patches, D=128.  B=4 exercises the Bt>1 batch-blocked
    # path while keeping a 2-step parallel grid.
    B, C, H, W = 4, 3, 32, 32
    ph = pw = 8
    D = 128
    Hp, Wp = H // ph, W // pw
    N = Hp * Wp

    key = jax.random.PRNGKey(0)
    kx, kw, kb, kc, kp = jax.random.split(key, 5)
    x = jax.random.normal(kx, (B, C, H, W), dtype=jnp.float32)
    conv_w = jax.random.normal(kw, (D, C, ph, pw), dtype=jnp.float32) * 0.02
    conv_b = jax.random.normal(kb, (D,), dtype=jnp.float32) * 0.02
    cls_token = jax.random.normal(kc, (1, 1, D), dtype=jnp.float32) * 0.02
    pos_embedding = jax.random.normal(kp, (1, N + 1, D), dtype=jnp.float32) * 0.02

    out = vit_embedding(x, conv_w, conv_b, cls_token, pos_embedding,
                        patch_size=(ph, pw))
    jax.block_until_ready(out)

    # Pure-JAX reference: literal Conv2d(stride=patch) -> rearrange -> cls/pos.
    ref_conv = lax.conv_general_dilated(
        x, conv_w, window_strides=(ph, pw), padding="VALID",
        dimension_numbers=("NCHW", "OIHW", "NCHW"))                 # (B, D, Hp, Wp)
    ref_tok = ref_conv.reshape(B, D, N).transpose(0, 2, 1) + conv_b[None, None, :]
    ref = jnp.concatenate(
        [jnp.broadcast_to(cls_token, (B, 1, D)), ref_tok], axis=1)
    ref = ref + pos_embedding[:, : N + 1]

    err = float(jnp.max(jnp.abs(out - ref)))
    # bf16 MXU operands with f32 accumulation -> tolerance set accordingly.
    assert err < 3e-2, f"mismatch vs reference, max abs err = {err}"
    print("KERNEL_OK")
</pallas_src>

<mosaic_0001>
module attributes {stable_mosaic.version = 11 : i64} {
  func.func @_vit_embed_kernel(%arg0: i32, %arg1: memref<2x17x192xbf16, #tpu.memory_space<vmem>>, %arg2: memref<192x128xbf16, #tpu.memory_space<vmem>>, %arg3: memref<17x128xf32, #tpu.memory_space<vmem>>, %arg4: memref<2x17x128xf32, #tpu.memory_space<vmem>>) attributes {dimension_semantics = [#tpu.dimension_semantics<parallel>], iteration_bounds = array<i64: 2>, scalar_prefetch = 0 : i64, scratch_operands = 0 : i64, tpu.core_type = #tpu.core_type<tc>, window_params = [{transform_indices = @transform_0, window_bounds = array<i64: 2, 17, 192>}, {pipeline_mode = #tpu.pipeline_mode<synchronous>, transform_indices = @transform_1, window_bounds = array<i64: 192, 128>}, {pipeline_mode = #tpu.pipeline_mode<synchronous>, transform_indices = @transform_2, window_bounds = array<i64: 17, 128>}, {transform_indices = @transform_3, window_bounds = array<i64: 2, 17, 128>}]} {
    %c0 = arith.constant 0 : index
    %c0_0 = arith.constant 0 : index
    %0 = vector.load %arg2[%c0, %c0_0] : memref<192x128xbf16, #tpu.memory_space<vmem>>, vector<192x128xbf16>
    %c0_1 = arith.constant 0 : index
    %c0_2 = arith.constant 0 : index
    %1 = vector.load %arg3[%c0_1, %c0_2] : memref<17x128xf32, #tpu.memory_space<vmem>>, vector<17x128xf32>
    %c0_3 = arith.constant 0 : index
    %c0_4 = arith.constant 0 : index
    %c0_5 = arith.constant 0 : index
    %2 = vector.load %arg1[%c0_3, %c0_4, %c0_5] : memref<2x17x192xbf16, #tpu.memory_space<vmem>>, vector<1x17x192xbf16>
    %3 = vector.shape_cast %2 : vector<1x17x192xbf16> to vector<17x192xbf16>
    %cst = arith.constant dense<0.000000e+00> : vector<17x128xf32>
    %4 = tpu.matmul %3, %0, %cst {dimension_numbers = #tpu.dot_dimension_numbers<[1], [0], [0], [1], [0, 0, 1, 1], [], []>} : vector<17x192xbf16>, vector<192x128xbf16>, vector<17x128xf32> -> vector<17x128xf32>
    %5 = arith.addf %4, %1 : vector<17x128xf32>
    %c0_6 = arith.constant 0 : index
    %c0_7 = arith.constant 0 : index
    %c0_8 = arith.constant 0 : index
    %6 = vector.load %arg4[%c0_6, %c0_7, %c0_8] : memref<2x17x128xf32, #tpu.memory_space<vmem>>, vector<1x17x128xf32>
    %7 = vector.shape_cast %6 : vector<1x17x128xf32> to vector<17x128xf32>
    %8 = vector.shape_cast %5 : vector<17x128xf32> to vector<1x17x128xf32>
    tpu.vector_store %arg4[%c0_6, %c0_7, %c0_8], %8 {strides = array<i32>} : memref<2x17x128xf32, #tpu.memory_space<vmem>>, vector<1x17x128xf32>,
    %c1 = arith.constant 1 : index
    %c0_9 = arith.constant 0 : index
    %c0_10 = arith.constant 0 : index
    %9 = vector.load %arg1[%c1, %c0_9, %c0_10] : memref<2x17x192xbf16, #tpu.memory_space<vmem>>, vector<1x17x192xbf16>
    %10 = vector.shape_cast %9 : vector<1x17x192xbf16> to vector<17x192xbf16>
    %cst_11 = arith.constant dense<0.000000e+00> : vector<17x128xf32>
    %11 = tpu.matmul %10, %0, %cst_11 {dimension_numbers = #tpu.dot_dimension_numbers<[1], [0], [0], [1], [0, 0, 1, 1], [], []>} : vector<17x192xbf16>, vector<192x128xbf16>, vector<17x128xf32> -> vector<17x128xf32>
    %12 = arith.addf %11, %1 : vector<17x128xf32>
    %c1_12 = arith.constant 1 : index
    %c0_13 = arith.constant 0 : index
    %c0_14 = arith.constant 0 : index
    %13 = vector.load %arg4[%c1_12, %c0_13, %c0_14] : memref<2x17x128xf32, #tpu.memory_space<vmem>>, vector<1x17x128xf32>
    %14 = vector.shape_cast %13 : vector<1x17x128xf32> to vector<17x128xf32>
    %15 = vector.shape_cast %12 : vector<17x128xf32> to vector<1x17x128xf32>
    tpu.vector_store %arg4[%c1_12, %c0_13, %c0_14], %15 {strides = array<i32>} : memref<2x17x128xf32, #tpu.memory_space<vmem>>, vector<1x17x128xf32>,
    return
  }
  func.func @transform_0(%arg0: i32) -> (i32, i32, i32) {
    %c0_i32 = arith.constant 0 : i32
    %c0_i32_0 = arith.constant 0 : i32
    %c0_i32_1 = arith.constant 0 : i32
    return %arg0, %c0_i32, %c0_i32_0 : i32, i32, i32
  }
  func.func @transform_1(%arg0: i32) -> (i32, i32) {
    %c0_i32 = arith.constant 0 : i32
    %c0_i32_0 = arith.constant 0 : i32
    %c0_i32_1 = arith.constant 0 : i32
    return %c0_i32, %c0_i32_0 : i32, i32
  }
  func.func @transform_2(%arg0: i32) -> (i32, i32) {
    %c0_i32 = arith.constant 0 : i32
    %c0_i32_0 = arith.constant 0 : i32
    %c0_i32_1 = arith.constant 0 : i32
    return %c0_i32, %c0_i32_0 : i32, i32
  }
  func.func @transform_3(%arg0: i32) -> (i32, i32, i32) {
    %c0_i32 = arith.constant 0 : i32
    %c0_i32_0 = arith.constant 0 : i32
    %c0_i32_1 = arith.constant 0 : i32
    return %arg0, %c0_i32, %c0_i32_0 : i32, i32, i32
  }
}

</mosaic_0001>

<bundles_post_ra>
// kernel: _vit_embedding.1
= control target key start
LH: loop header
LB: loop body
LE: loop exit
PB: predicated region body
PF: predicated region fallthrough
CT: control target
= control target key end

     0   :  { %s592_s12 = smov 0   ;;  %s697_s0 = inlined_call_operand.vmem [shape: bf16[4,17,192], index: 0, kind: input, shape index: {}]   ;;  %s698_s1 = inlined_call_operand.vmem [shape: bf16[192,128], index: 1, kind: input, shape index: {}]   ;;  %s699_s2 = inlined_call_operand.vmem [shape: f32[17,128], index: 2, kind: input, shape index: {}]   ;;  %s700_s3 = inlined_call_operand.vmem [shape: f32[4,17,128], index: 3, kind: output, shape index: {}]  }
   0x1 LB: > { %s490_s13 = sadd.s32 4294967295, %s569_s12   ;;  %p494_p0 = scmp.ge.s32.totalorder %s569_s12, 1  ;;  %s569_s12 = sphi %s592_s12, %s13_s12  }
   0x2   : > { %p139_p1 = scmp.lt.s32.totalorder %s569_s12, 3 }
   0x4   : > { %p140_p2 = pnand %p494_p0, %p139_p1 }
   0x5   : > { %v541_v0 = vld [vmem:[%s698_s1] sm:$0xff] (!%p140_p2)   ;;  %v571_v1 = vmov (!%p140_p2), 0   ;;  %s495_s16 = sshll.u32 (!%p140_p2), %s490_s13, 1  ;;  %v542_v2 = vld [vmem:[%s698_s1 + $0x8] sm:$0xff] (!%p140_p2)   ;;  %v543_v3 = vld [vmem:[%s698_s1 + $0x10] sm:$0xff] (!%p140_p2)   ;;  %vm297_vm0 = vcmask (!%p140_p2), 523264  }
   0x6   : > { %143 = sbr.rel (%p140_p2) target bundleno = 277 (0x115), region = 32  ;;  %304 = vmatprep.subr.bf16.mxu0 (!%p140_p2), %v571_v1  ;;  %380 = vmatprep.subr.bf16.mxu1 (!%p140_p2), %v571_v1  ;;  %p166_p3 = scmp.lt.s32.totalorder (!%p140_p2), %s495_s16, 3  ;;  %v544_v4 = vld [vmem:[%s698_s1 + $0x18] sm:$0xff] (!%p140_p2)   ;;  %v545_v6 = vld [vmem:[%s698_s1 + $0x20] sm:$0xff] (!%p140_p2)   ;;  %v546_v8 = vld [vmem:[%s698_s1 + $0x28] sm:$0xff] (!%p140_p2)  }
   0x7   : > { %305 = vmatpush1.bf16.msra.mxu0 (!%p140_p2), %v541_v0  ;;  %381 = vmatpush1.bf16.msra.mxu1 (!%p140_p2), %v541_v0  ;;  %v547_v9 = vld [vmem:[%s698_s1 + $0x30] sm:$0xff] (!%p140_p2)   ;;  %v548_v10 = vld [vmem:[%s698_s1 + $0x38] sm:$0xff] (!%p140_p2)   ;;  %v549_v11 = vld [vmem:[%s698_s1 + $0x40] sm:$0xff] (!%p140_p2)  }
   0x8   : > { %306 = vmatprep.subr.bf16.mxu0 (!%p140_p2), %v571_v1  ;;  %382 = vmatprep.subr.bf16.mxu1 (!%p140_p2), %v571_v1  ;;  %v550_v12 = vld [vmem:[%s698_s1 + $0x48] sm:$0xff] (!%p140_p2)   ;;  %v551_v13 = vld [vmem:[%s698_s1 + $0x50] sm:$0xff] (!%p140_p2)   ;;  %v552_v14 = vld [vmem:[%s698_s1 + $0x58] sm:$0xff] (!%p140_p2)  }
   0x9   : > { %v204_v23 = vld [vmem:[%s699_s2] sm:$0xff] (!%p140_p2)  ;;  %v205_v26 = vld [vmem:[%s699_s2 + $0x8] sm:$0xff] (!%p140_p2)  ;;  %v206_v37 = vld [vmem:[%s699_s2 + $0x10] sm:$0x1] (!%p140_p2) }
   0xb   : > { %307 = vmatpush1.bf16.msra.mxu0 (!%p140_p2), %v542_v2  ;;  %383 = vmatpush1.bf16.msra.mxu1 (!%p140_p2), %v542_v2 }
   0xc   : > { %308 = vmatprep.subr.bf16.mxu0 (!%p140_p2), %v571_v1  ;;  %384 = vmatprep.subr.bf16.mxu1 (!%p140_p2), %v571_v1 }
   0xd   : > { %s702_s16 = smov (!%p166_p3, %s495_s16), 3 }
   0xe   : > { %s531_s21 = smul.u32 24, %s702_s16 }
   0xf   : > { %309 = vmatpush1.bf16.msra.mxu0 %v543_v3  ;;  %385 = vmatpush1.bf16.msra.mxu1 %v543_v3 }
  0x10   : > { %s626_s26 = scalar_lea.vmem %s697_s0, %s531_s21  ;;  %310 = vmatprep.subr.bf16.mxu0 %v571_v1  ;;  %386 = vmatprep.subr.bf16.mxu1 %v571_v1  ;;  %s177_s23 = scalar_lea.vmem %s700_s3, %s531_s21 }
  0x11   : > { %v555_v5 = vld [vmem:[%s626_s26 + $0x4] ss:$8 sps:$4 sm:$0xff]   ;;  %v209_v15 = vld [vmem:[%s626_s26 + $0x10] sm:$0x11]  ;;  %v553_v17 = vld [vmem:[%s626_s26] ss:$8 sps:$4 sm:$0xff]  }
  0x12   : > { %v558_v7 = vld [vmem:[%s626_s26 + $0x1c] ss:$8 sps:$4 sm:$0xff]   ;;  %515 = vmatprep.mubr.msk.bf16.mxu0 %vm297_vm0, %v555_v5  ;;  %v519_v16 = vld [vmem:[%s626_s26 + $0x28] sm:$0x11]  ;;  %v556_v18 = vld [vmem:[%s626_s26 + $0x18] ss:$8 sps:$4 sm:$0xff]   ;;  %v502_v19 = vcombine.high %v209_v15, %v209_v15  ;;  %v501_v21 = vcombine.low %v209_v15, %v209_v15 }
  0x13   : > { %311 = vmatpush1.bf16.msra.mxu0 %v544_v4  ;;  %387 = vmatpush1.bf16.msra.mxu1 %v544_v4  ;;  %v523_v20 = vcombine.high %v519_v16, %v519_v16  ;;  %v522_v22 = vcombine.low %v519_v16, %v519_v16 }
  0x14   : > { %312 = vmatprep.subr.bf16.mxu0 %v571_v1  ;;  %388 = vmatprep.subr.bf16.mxu1 %v571_v1 }
  0x15   : > { %524 = vmatprep.mubr.msk.bf16.mxu1 %vm297_vm0, %v558_v7 }
  0x17   : > { %313 = vmatpush1.bf16.msra.mxu0 %v545_v6  ;;  %389 = vmatpush1.bf16.msra.mxu1 %v545_v6 }
  0x18   : > { %314 = vmatprep.subr.bf16.mxu0 %v571_v1  ;;  %390 = vmatprep.subr.bf16.mxu1 %v571_v1 }
  0x1b   : > { %315 = vmatpush1.bf16.msra.mxu0 %v546_v8  ;;  %391 = vmatpush1.bf16.msra.mxu1 %v546_v8 }
  0x1c   : > { %316 = vmatprep.subr.bf16.mxu0 %v571_v1  ;;  %392 = vmatprep.subr.bf16.mxu1 %v571_v1 }
  0x1f   : > { %317 = vmatpush1.bf16.msra.mxu0 %v547_v9  ;;  %393 = vmatpush1.bf16.msra.mxu1 %v547_v9 }
  0x20   : > { %318 = vmatprep.subr.bf16.mxu0 %v571_v1  ;;  %394 = vmatprep.subr.bf16.mxu1 %v571_v1 }
  0x23   : > { %319 = vmatpush1.bf16.msra.mxu0 %v548_v10  ;;  %395 = vmatpush1.bf16.msra.mxu1 %v548_v10 }
  0x24   : > { %320 = vmatprep.subr.bf16.mxu0 %v571_v1  ;;  %396 = vmatprep.subr.bf16.mxu1 %v571_v1 }
  0x27   : > { %321 = vmatpush1.bf16.msra.mxu0 %v549_v11  ;;  %397 = vmatpush1.bf16.msra.mxu1 %v549_v11 }
  0x28   : > { %322 = vmatprep.subr.bf16.mxu0 %v571_v1  ;;  %398 = vmatprep.subr.bf16.mxu1 %v571_v1 }
  0x2b   : > { %323 = vmatpush1.bf16.msra.mxu0 %v550_v12  ;;  %399 = vmatpush1.bf16.msra.mxu1 %v550_v12 }
  0x2c   : > { %324 = vmatprep.subr.bf16.mxu0 %v571_v1  ;;  %400 = vmatprep.subr.bf16.mxu1 %v571_v1 }
  0x2f   : > { %325 = vmatpush1.bf16.msra.mxu0 %v551_v13  ;;  %401 = vmatpush1.bf16.msra.mxu1 %v551_v13 }
  0x30   : > { %326 = vmatprep.subr.bf16.mxu0 %v571_v1  ;;  %402 = vmatprep.subr.bf16.mxu1 %v571_v1 }
  0x33   : > { %327 = vmatpush1.bf16.msra.mxu0 %v552_v14  ;;  %403 = vmatpush1.bf16.msra.mxu1 %v552_v14 }
  0x36   : > { %337 = vmatmul.mubr.bf16.vlgmr.msra.gmra.mrb[0].mxu0 %v553_v17  ;;  %413 = vmatmul.mubr.bf16.vlgmr.msra.gmra.mrb[0].mxu1 %v556_v18 }
  0x37   : > { %516 = vmatprep.mubr.msk.bf16.mxu0 %vm297_vm0, %v502_v19  ;;  %525 = vmatprep.mubr.msk.bf16.mxu1 %vm297_vm0, %v523_v20 }
  0x3e   : > { %345 = vmatmul.mubr.bf16.gmra.mrb[4].mxu0 %v501_v21  ;;  %421 = vmatmul.mubr.bf16.gmra.mrb[4].mxu1 %v522_v22 }
 0x109   : > { %v338_v24 = vpop.f32.mrb[0].mxu0  ;;  %v414_v25 = vpop.f32.mrb[0].mxu1 }
 0x10a   : > { %v339_v27 = vadd.f32 %v338_v24, %v204_v23  ;;  %v415_v28 = vadd.f32 %v414_v25, %v204_v23  ;;  %v340_v29 = vpop.f32.mrb[1].mxu0  ;;  %v416_v30 = vpop.f32.mrb[1].mxu1 }
 0x10b   : > { %v341_v31 = vpop.f32.mrb[2].mxu0  ;;  %v417_v32 = vpop.f32.mrb[2].mxu1 }
 0x10c   : > { %352 = vst [vmem:[%s177_s23] sm:$0xff] %v339_v27  ;;  %v342_v33 = vadd.f32 %v341_v31, %v205_v26  ;;  %v418_v34 = vadd.f32 %v417_v32, %v205_v26  ;;  %v343_v35 = vpop.f32.mrb[3].mxu0  ;;  %v419_v36 = vpop.f32.mrb[3].mxu1  ;;  %526 = vst [vmem:[%s177_s23 + $0x18] sm:$0xff] %v415_v28 }
 0x10e   : > { %353 = vst [vmem:[%s177_s23 + $0x8] sm:$0xff] %v342_v33  ;;  %527 = vst [vmem:[%s177_s23 + $0x20] sm:$0xff] %v418_v34 }
 0x111   : > { %v346_v38 = vpop.f32.mrb[4].mxu0  ;;  %v422_v39 = vpop.f32.mrb[4].mxu1 }
 0x112   : > { %v347_v40 = vadd.f32 %v346_v38, %v206_v37  ;;  %v423_v41 = vadd.f32 %v422_v39, %v206_v37  ;;  %v348_v42 = vpop.f32.mrb[5].mxu0  ;;  %v424_v43 = vpop.f32.mrb[5].mxu1 }
 0x113   : > { %v349_v44 = vpop.f32.mrb[6].mxu0  ;;  %v425_v45 = vpop.f32.mrb[6].mxu1 }
 0x114   : > { %354 = vst [vmem:[%s177_s23 + $0x10] sm:$0x1] %v347_v40  ;;  %v350_v46 = vpop.f32.mrb[7].mxu0  ;;  %v426_v47 = vpop.f32.mrb[7].mxu1  ;;  %528 = vst [vmem:[%s177_s23 + $0x28] sm:$0x1] %v423_v41 }
 0x115 PF: > { %s13_s12 = sadd.s32 1, %s569_s12  }
 0x116   : > { %p10_p4 = scmp.ge.s32.totalorder %s13_s12, 4  }
 0x118   :  { %12 = sbr.rel (!%p10_p4) target bundleno = 1 (0x1), region = 64 }

</bundles_post_ra>
